<compile_context>
chip_gen: v7x
topology: tpu7x:2x2x1
jax: 0.10.0
libtpu: 0.0.40
codegen_flags: <defaults>
</compile_context>

<pallas_src>
import functools

import jax
import jax.numpy as jnp
from jax.experimental import pallas as pl
from jax.experimental.pallas import tpu as pltpu

NEG_SLOPE = 0.3


def _glu_kernel(out_ref, gate_ref, o_ref, *, compute_dtype):
    out = out_ref[...].astype(compute_dtype)
    gate = gate_ref[...].astype(compute_dtype)
    lrelu = jnp.where(gate >= 0, gate, NEG_SLOPE * gate)
    o_ref[...] = (out * lrelu).astype(o_ref.dtype)


def _compute_dtype(in_dtype):
    """bf16 stays bf16 on chips with a bf16 VALU (v6e/v7x); upcast elsewhere."""
    if jnp.dtype(in_dtype) != jnp.dtype(jnp.bfloat16):
        return jnp.float32
    try:
        kind = jax.devices()[0].device_kind.lower()
    except Exception:
        kind = ""
    old_gen = any(t in kind for t in ("v2", "v3", "v4", "v5"))
    return jnp.float32 if old_gen else jnp.bfloat16


def _vmem_budget_bytes():
    """Generation-aware planning budget: <= half of physical VMEM, <= 32 MiB."""
    cap = None
    try:
        cap = pltpu.get_tpu_info().vmem_capacity_bytes
    except Exception:
        cap = None
    if not cap:
        cap = 64 << 20  # conservative: v7x per-TensorCore VMEM
    return min(32 << 20, cap // 2)


def _pick_lane_extent(e_pad, max_lane_tile):
    """Largest multiple of 128 that divides e_pad, <= max_lane_tile, and (when
    there is enough data) leaves >= 8 rows so vregs are fully occupied."""
    cap = max(128, min(max_lane_tile, e_pad))
    if e_pad >= 8 * 128:
        cap = max(128, min(cap, e_pad // 8))
    lane = (cap // 128) * 128
    while lane > 128 and e_pad % lane != 0:
        lane -= 128
    return lane


def glu_activation(x, *, target_tile_bytes=4 << 20, max_lane_tile=4096):
    """x: (N, 2C, H, W) -> (N, C, H, W), matching torch x.chunk(2, dim=1)."""
    N, C2, H, W = x.shape
    assert C2 % 2 == 0, "channel dim must be even for GLU chunk"
    C = C2 // 2
    E = C * H * W

    if N == 0 or E == 0:
        return jnp.zeros((N, C, H, W), x.dtype)

    itemsize = jnp.dtype(x.dtype).itemsize

    # ---- layout: flatten each half to E elements, re-split lane-dense -------
    e_pad = ((E + 127) // 128) * 128
    x_flat = x.reshape(N, 2, E)                    # metadata-only
    if e_pad != E:
        # Fallback for non-128-aligned extents: one padding copy keeps every
        # kernel tile lane-dense (unmasked vst) instead of masked partial stores.
        x_flat = jnp.pad(x_flat, ((0, 0), (0, 0), (0, e_pad - E)))

    lane = _pick_lane_extent(e_pad, max_lane_tile)
    rows = e_pad // lane
    x4 = x_flat.reshape(N, 2, rows, lane)          # metadata-only

    # ---- tile plan: ~target_tile_bytes per tile, 6 live buffers in budget ---
    headroom = 4 << 20
    budget = _vmem_budget_bytes()
    tile_target = max(8 * lane * itemsize,
                      min(target_tile_bytes, (budget - headroom) // 6))
    rows_per_tile = max(8, ((tile_target // (lane * itemsize)) // 8) * 8)
    tr = rows if rows <= rows_per_tile else rows_per_tile  # full extent or 8-multiple

    tile_bytes = tr * lane * itemsize
    vmem_limit = int(max(6 * tile_bytes + headroom, 16 << 20))

    grid = (N, pl.cdiv(rows, tr))
    in_block = (pl.Squeezed(), pl.Squeezed(), tr, lane)
    in_specs = [
        pl.BlockSpec(in_block, lambda n, r: (n, 0, r, 0)),   # "out" half
        pl.BlockSpec(in_block, lambda n, r: (n, 1, r, 0)),   # "gate" half
    ]
    out_spec = pl.BlockSpec((pl.Squeezed(), tr, lane), lambda n, r: (n, r, 0))

    cost = pl.CostEstimate(
        flops=4 * N * E,
        transcendentals=0,
        bytes_accessed=3 * N * E * itemsize,
    )

    kernel = functools.partial(_glu_kernel, compute_dtype=_compute_dtype(x.dtype))

    out4 = pl.pallas_call(
        kernel,
        out_shape=jax.ShapeDtypeStruct((N, rows, lane), x.dtype),
        grid=grid,
        in_specs=in_specs,
        out_specs=out_spec,
        compiler_params=pltpu.CompilerParams(
            dimension_semantics=("parallel", "parallel"),
            vmem_limit_bytes=vmem_limit,
        ),
        cost_estimate=cost,
    )(x4, x4)

    out = out4.reshape(N, e_pad)
    if e_pad != E:
        out = out[:, :E]
    return out.reshape(N, C, H, W)


def glu_reference(x):
    C = x.shape[1] // 2
    out, gate = x[:, :C], x[:, C:]
    return out * jnp.where(gate >= 0, gate, NEG_SLOPE * gate)


if __name__ == "__main__":
    key = jax.random.PRNGKey(0)

    # Primary small NCHW case: batch=2, channels=8 (-> 4 after chunk), 16x16.
    x = jax.random.normal(key, (2, 8, 16, 16), dtype=jnp.float32)
    y = jax.block_until_ready(glu_activation(x))
    assert y.shape == (2, 4, 16, 16)
    assert jnp.allclose(y, glu_reference(x), atol=1e-6, rtol=1e-6)

    # Multi-tile grid along the row axis (forced small tiles).
    x2 = jax.random.normal(jax.random.PRNGKey(1), (1, 16, 64, 64), dtype=jnp.float32)
    y2 = jax.block_until_ready(
        glu_activation(x2, target_tile_bytes=64 << 10, max_lane_tile=512))
    assert y2.shape == (1, 8, 64, 64)
    assert jnp.allclose(y2, glu_reference(x2), atol=1e-6, rtol=1e-6)

    # Non-128-aligned spatial extent exercises the padded fallback path.
    x3 = jax.random.normal(jax.random.PRNGKey(2), (2, 6, 5, 7), dtype=jnp.float32)
    y3 = jax.block_until_ready(glu_activation(x3))
    assert y3.shape == (2, 3, 5, 7)
    assert jnp.allclose(y3, glu_reference(x3), atol=1e-6, rtol=1e-6)

    print("KERNEL_OK")
</pallas_src>

<mosaic_0001>
module attributes {stable_mosaic.version = 11 : i64} {
  func.func @_glu_kernel(%arg0: i32, %arg1: i32, %arg2: memref<1x1x8x128xf32, #tpu.memory_space<vmem>>, %arg3: memref<1x1x8x128xf32, #tpu.memory_space<vmem>>, %arg4: memref<1x8x128xf32, #tpu.memory_space<vmem>>) attributes {dimension_semantics = [#tpu.dimension_semantics<parallel>, #tpu.dimension_semantics<parallel>], iteration_bounds = array<i64: 2, 1>, scalar_prefetch = 0 : i64, scratch_operands = 0 : i64, tpu.core_type = #tpu.core_type<tc>, window_params = [{transform_indices = @transform_0, window_bounds = array<i64: 1, 1, 8, 128>}, {transform_indices = @transform_1, window_bounds = array<i64: 1, 1, 8, 128>}, {transform_indices = @transform_2, window_bounds = array<i64: 1, 8, 128>}]} {
    %c0 = arith.constant 0 : index
    %c0_0 = arith.constant 0 : index
    %c0_1 = arith.constant 0 : index
    %c0_2 = arith.constant 0 : index
    %0 = vector.load %arg2[%c0, %c0_0, %c0_1, %c0_2] : memref<1x1x8x128xf32, #tpu.memory_space<vmem>>, vector<1x1x8x128xf32>
    %1 = vector.shape_cast %0 : vector<1x1x8x128xf32> to vector<8x128xf32>
    %c0_3 = arith.constant 0 : index
    %c0_4 = arith.constant 0 : index
    %c0_5 = arith.constant 0 : index
    %c0_6 = arith.constant 0 : index
    %2 = vector.load %arg3[%c0_3, %c0_4, %c0_5, %c0_6] : memref<1x1x8x128xf32, #tpu.memory_space<vmem>>, vector<1x1x8x128xf32>
    %3 = vector.shape_cast %2 : vector<1x1x8x128xf32> to vector<8x128xf32>
    %cst = arith.constant 0.000000e+00 : f32
    %4 = vector.broadcast %cst : f32 to vector<8x128xf32>
    %5 = arith.cmpf oge, %3, %4 : vector<8x128xf32>
    %cst_7 = arith.constant 3.000000e-01 : f32
    %6 = vector.broadcast %cst_7 : f32 to vector<8x128xf32>
    %7 = arith.mulf %6, %3 : vector<8x128xf32>
    %8 = arith.select %5, %3, %7 : vector<8x128xi1>, vector<8x128xf32>
    %9 = arith.mulf %1, %8 : vector<8x128xf32>
    %c0_8 = arith.constant 0 : index
    %c0_9 = arith.constant 0 : index
    %c0_10 = arith.constant 0 : index
    %10 = vector.load %arg4[%c0_8, %c0_9, %c0_10] : memref<1x8x128xf32, #tpu.memory_space<vmem>>, vector<1x8x128xf32>
    %11 = vector.shape_cast %10 : vector<1x8x128xf32> to vector<8x128xf32>
    %12 = vector.shape_cast %9 : vector<8x128xf32> to vector<1x8x128xf32>
    tpu.vector_store %arg4[%c0_8, %c0_9, %c0_10], %12 {strides = array<i32>} : memref<1x8x128xf32, #tpu.memory_space<vmem>>, vector<1x8x128xf32>,
    return
  }
  func.func @transform_0(%arg0: i32, %arg1: i32) -> (i32, i32, i32, i32) {
    %c0_i32 = arith.constant 0 : i32
    %c0_i32_0 = arith.constant 0 : i32
    %c0_i32_1 = arith.constant 0 : i32
    return %arg0, %c0_i32, %arg1, %c0_i32_0 : i32, i32, i32, i32
  }
  func.func @transform_1(%arg0: i32, %arg1: i32) -> (i32, i32, i32, i32) {
    %c1_i32 = arith.constant 1 : i32
    %c0_i32 = arith.constant 0 : i32
    %c0_i32_0 = arith.constant 0 : i32
    return %arg0, %c1_i32, %arg1, %c0_i32 : i32, i32, i32, i32
  }
  func.func @transform_2(%arg0: i32, %arg1: i32) -> (i32, i32, i32) {
    %c0_i32 = arith.constant 0 : i32
    %c0_i32_0 = arith.constant 0 : i32
    return %arg0, %arg1, %c0_i32 : i32, i32, i32
  }
}

</mosaic_0001>

<bundles_post_ra>
// kernel: tpu_custom_call.1
= control target key start
LH: loop header
LB: loop body
LE: loop exit
PB: predicated region body
PF: predicated region fallthrough
CT: control target
= control target key end

     0   :  { %7 = vsyncpa [#allocation3], 0  ;;  %s821_s0 = inlined_call_operand.hbm [shape: f32[2,2,8,128], index: 0, kind: input, shape index: {}]   ;;  %s822_s1 = inlined_call_operand.hbm [shape: f32[2,2,8,128], index: 1, kind: input, shape index: {}]   ;;  %s823_s2 = inlined_call_operand.hbm [shape: f32[2,8,128], index: 2, kind: output, shape index: {}]  }
   0x1   :  { %9 = vsyncpa [#allocation3 + $0x1], 0 }
   0x2   :  { %10 = vsyncpa [#allocation6], 0 }
   0x3   :  { %12 = vsyncpa [#allocation6 + $0x1], 0 }
   0x4   :  { %13 = vsyncpa [#allocation4], 0 }
   0x5   :  { %15 = vsyncpa [#allocation4 + $0x1], 0  ;;  %s602_s9 = smov 0   ;;  %s604_s10 = smov 0  }
   0x6   :  { %s606_s11 = smov 0   ;;  %s608_s12 = smov 0  }
   0x7   :  { %s610_s13 = smov 0   ;;  %s612_s14 = smov 0  }
   0x8 LB: > { %s348_s15 = sadd.s32 4294967295, %s582_s14   ;;  %s349_s16 = sadd.s32 4294967294, %s582_s14   ;;  %s582_s14 = sphi %s612_s14, %s21_s14   ;;  %s578_s13 = sphi %s610_s13, %s843_s13   ;;  %s574_s12 = sphi %s608_s12, %s842_s12   ;;  %s570_s11 = sphi %s606_s11, %s841_s11   ;;  %s566_s10 = sphi %s604_s10, %s840_s10   ;;  %s562_s9 = sphi %s602_s9, %s839_s9  }
   0x9   : > { %s33_s17 = sadd.s32 1, %s578_s13  ;;  %s42_s18 = sadd.s32 1, %s570_s11 }
   0xa   : > { %p35_p0 = scmp.ge.s32.totalorder %s33_s17, 2  ;;  %p49_p1 = scmp.ne.s32.totalorder %s570_s11, %s566_s10 }
   0xb   : > { %p50_p2 = scmp.eq.s32.totalorder %s582_s14, 0  ;;  %p55_p3 = scmp.ne.s32.totalorder %s566_s10, %s562_s9 }
   0xc   : > { %s845_s17 = smov (%p35_p0, %s33_s17), 0  ;;  %p56_p5 = scmp.eq.s32.totalorder %s348_s15, 0 }
   0xd   : > { %p643_p4 = por %p50_p2, %p49_p1  ;;  %s37_s20 = ssub.s32 %s578_s13, %s845_s17 }
   0xe   : > { %p109_p6 = scmp.eq.s32.totalorder %s348_s15, 1  ;;  %p40_p7 = scmp.eq.s32.totalorder %s37_s20, 0 }
   0xf   : > { %p649_p8 = por %p56_p5, %p55_p3  ;;  %p115_p10 = scmp.eq.s32.totalorder %s349_s16, 1 }
  0x10   : > { %p653_p9 = por %p109_p6, %p49_p1  ;;  %p385_p13 = scmp.lt.s32.totalorder %s582_s14, 2 }
  0x11   : > { %s827_s21 = scalar_select %p649_p8, 1, 0 }
  0x12   : > { %s828_s22 = scalar_select %p653_p9, 1, 0 }
  0x13   : > { %s658_s23 = scalar_select %p40_p7, %s570_s11, %s42_s18  }
  0x14   : > { %p660_p11 = por %p115_p10, %p55_p3  ;;  %s667_s25 = sand.u32 1, %s570_s11  }
  0x15   : > { %s352_s26 = sshll.u32 %s667_s25, 3  ;;  %s366_s27 = sshll.u32 %s578_s13, 8 }
  0x16   : > { %s829_s24 = scalar_select %p660_p11, 1, 0 }
  0x17   : > { %s676_s30 = scalar_lea.hbm %s821_s0, %s366_s27  ;;  %s139_s3 = scalar_lea.vmem [#allocation2], %s352_s26 }
  0x18   : > { %s148_s4 = sshll.u32 %s139_s3, 4  ;;  %p684_p0 = pnand %p385_p13, %p643_p4  ;;  %s680_s4 = int_to_ptr.vmem [resolvable:$true] %s148_s4 }
  0x19   : > { %s136_s6 = scalar_lea.sflag [#allocation3], %s667_s25  ;;  %s435_s7 = scalar_lea.hbm %s676_s30, 128 }
  0x1a   : > { %p436_p3 = scmp.ne.s32.totalorder %s676_s30, %s435_s7  ;;  %p437_p5 = pneg %p684_p0 }
  0x1b   : > { %s440_s16 = scalar_lea.hbm %s821_s0, 512  ;;  %p441_p4 = scmp.lt.u32.totalorder %s676_s30, %s821_s0 }
  0x1c   : > { %p438_p6 = pnand %p437_p5, %p436_p3  ;;  %p442_p10 = scmp.lt.u32.totalorder %s440_s16, %s435_s7 }
  0x1d   : > { %p444_p12 = scmp.lt.u32.totalorder %s435_s7, %s676_s30 }
  0x1e   : > { %p439_p7 = pneg %p438_p6  ;;  %p443_p13 = por %p442_p10, %p441_p4 }
  0x20   : > { %p445_p1 = por %p444_p12, %p443_p13 }
  0x22   : > { %p446_p2 = pnand %p445_p1, %p439_p7 }
  0x24   : > { %449 = shalt.err (!%p446_p2)
}
  0x25   : > { %s450_s20 = scalar_lea.vmem %s680_s4, 128  ;;  %s584_s28 = smov [#allocation2]  }
  0x26   : > { %p451_p3 = scmp.ne.s32.totalorder %s680_s4, %s450_s20  ;;  %s455_s29 = sshll.u32 %s584_s28, 4  ;;  %s456_s29 = int_to_ptr.vmem [resolvable:$false] %s455_s29 }
  0x27   : > { %s457_s3 = scalar_lea.vmem %s456_s29, 256  ;;  %p458_p9 = scmp.lt.s32.totalorder %s680_s4, %s456_s29 }
  0x28   : > { %p453_p6 = pnand %p451_p3, %p437_p5  ;;  %p459_p4 = scmp.lt.s32.totalorder %s457_s3, %s450_s20 }
  0x2a   : > { %p454_p11 = pneg %p453_p6  ;;  %p460_p10 = por %p459_p4, %p458_p9 }
  0x2c   : > { %p461_p12 = pnand %p460_p10, %p454_p11 }
  0x2e   : > { %464 = shalt.err (!%p461_p12)
}
  0x2f   : > { %377 = dma.hbm_to_vmem [thread:$0]  (!%p684_p0), %s676_s30, 128, %s680_s4, %s136_s6  }
  0x30   : > { %p831_p1 = scmp.lt.s32.totalorder %s582_s14, 3  ;;  %p832_p2 = scmp.ge.s32.totalorder %s582_s14, 1 }
  0x31   : > { %s281_s16 = scalar_lea.hbm %s822_s1, %s366_s27  ;;  %s159_s18 = scalar_lea.vmem [#allocation5], %s352_s26 }
  0x32   : > { %p720_p7 = pnand %p832_p2, %p831_p1  ;;  %s169_s19 = sshll.u32 %s159_s18, 4  ;;  %s170_s19 = int_to_ptr.vmem [resolvable:$true] %s169_s19 }
  0x33   : > { %s731_s20 = scalar_lea.hbm %s281_s16, 128  ;;  %s156_s30 = scalar_lea.sflag [#allocation6], %s667_s25 }
  0x34   : > { %s833_s7 = scalar_select %p720_p7, 1, 0 }
  0x35   : > { %s495_s4 = scalar_lea.hbm %s281_s16, 256  ;;  %s470_s27 = scalar_lea.hbm %s822_s1, 512 }
  0x36   : > { %p466_p9 = scmp.ne.s32.totalorder %s731_s20, %s495_s4  ;;  %p471_p3 = scmp.lt.u32.totalorder %s731_s20, %s822_s1 }
  0x37   : > { %p472_p6 = scmp.lt.u32.totalorder %s470_s27, %s495_s4  ;;  %p474_p10 = scmp.lt.u32.totalorder %s495_s4, %s731_s20 }
  0x38   : > { %p468_p11 = pnand %p466_p9, %p437_p5 }
  0x39   : > { %p473_p4 = por %p472_p6, %p471_p3 }
  0x3a   : > { %p469_p13 = pneg %p468_p11 }
  0x3b   : > { %p475_p12 = por %p474_p10, %p473_p4 }
  0x3d   : > { %p476_p1 = pnand %p475_p12, %p469_p13 }
  0x3f   : > { %479 = shalt.err (!%p476_p1)
}
  0x40   : > { %s480_s25 = scalar_lea.vmem %s170_s19, 128  ;;  %s585_s3 = smov [#allocation5]  }
  0x41   : > { %p481_p2 = scmp.ne.s32.totalorder %s170_s19, %s480_s25  ;;  %s485_s8 = sshll.u32 %s585_s3, 4  ;;  %s486_s8 = int_to_ptr.vmem [resolvable:$false] %s485_s8 }
  0x42   : > { %s487_s15 = scalar_lea.vmem %s486_s8, 256  ;;  %p488_p8 = scmp.lt.s32.totalorder %s170_s19, %s486_s8 }
  0x43   : > { %p483_p9 = pnand %p481_p2, %p437_p5  ;;  %p489_p7 = scmp.lt.s32.totalorder %s487_s15, %s480_s25 }
  0x45   : > { %p484_p11 = pneg %p483_p9  ;;  %p490_p3 = por %p489_p7, %p488_p8 }
  0x47   : > { %p491_p6 = pnand %p490_p3, %p484_p11 }
  0x49   : > { %494 = shalt.err (!%p491_p6)
}
  0x4a   : > { %380 = dma.hbm_to_vmem [thread:$0]  (!%p684_p0), %s731_s20, 128, %s170_s19, %s156_s30  }
  0x4b   : > { %p834_p13 = scmp.ne.s32.totalorder %s833_s7, 0 }
  0x4c   : > { %s755_s16 = sand.u32 (!%p834_p13), 1, %s566_s10   ;;  %p835_p5 = scmp.ne.s32.totalorder (!%p834_p13), %s827_s21, 0 }
  0x4d   : > { %178 = sbr.rel (%p834_p13) target bundleno = 113 (0x71), region = 28  ;;  %s359_s18 = sshll.u32 (!%p834_p13), %s755_s16, 3 }
  0x4e   : > { %s181_s4 = scalar_lea.sflag (!%p834_p13), [#allocation3], %s755_s16  ;;  %s184_s6 = scalar_lea.vmem (!%p834_p13), [#allocation2], %s359_s18 }
  0x54   : > { %549 = dma.done.wait (%p835_p5), %s181_s4, 128  }
  0x55   : > { %551 = vsyncadd (%p835_p5), %s181_s4, 4294967168  ;;  %s190_s5 = scalar_lea.sflag [#allocation6], %s755_s16  ;;  %s193_s19 = scalar_lea.vmem [#allocation5], %s359_s18 }
  0x56   : > { %553 = dma.done.wait (%p835_p5), %s190_s5, 128  }
  0x57   : > { %555 = vsyncadd (%p835_p5), %s190_s5, 4294967168  ;;  %v220_v0 = vld [vmem:[%s193_s19] sm:$0xff]  ;;  %v219_v1 = vld [vmem:[%s184_s6] sm:$0xff]  ;;  %s218_s7 = scalar_lea.vmem [#allocation7], %s359_s18  ;;  %s363_s30 = sshll.u32 %s574_s12, 7 }
  0x58   : > { %vm221_vm0 = vcmp.ge.f32.partialorder %v220_v0, 0.0  ;;  %v222_v2 = vmul.f32 0.3, %v220_v0  ;;  %s241_s20 = sshll.u32 %s218_s7, 4  ;;  %s774_s21 = scalar_lea.hbm %s823_s2, %s363_s30  ;;  %s769_s20 = int_to_ptr.vmem [resolvable:$true] %s241_s20 }
  0x59   : > { %s227_s29 = scalar_lea.sflag [#allocation4], %s755_s16  ;;  %s496_s26 = scalar_lea.vmem %s769_s20, 128 }
  0x5a   : > { %v223_v3 = vsel %vm221_vm0, %v220_v0, %v222_v2  ;;  %p497_p8 = scmp.ne.s32.totalorder %s769_s20, %s496_s26  ;;  %p836_p0 = scmp.ne.s32.totalorder %s828_s22, 0 }
  0x5b   : > { %v224_v4 = vmul.f32 %v223_v3, %v219_v1  ;;  %s586_s12 = smov [#allocation7]  }
  0x5c   : > { %p498_p7 = pnand %p497_p8, %p836_p0  ;;  %s500_s25 = sshll.u32 %s586_s12, 4  ;;  %s501_s25 = int_to_ptr.vmem [resolvable:$false] %s500_s25 }
  0x5d   : > { %225 = vst [vmem:[%s218_s7] sm:$0xff] %v224_v4  ;;  %s502_s3 = scalar_lea.vmem %s501_s25, 256  ;;  %p503_p10 = scmp.lt.s32.totalorder %s769_s20, %s501_s25 }
  0x5e   : > { %p499_p4 = pneg %p498_p7  ;;  %p504_p12 = scmp.lt.s32.totalorder %s502_s3, %s496_s26 }
  0x60   : > { %p505_p1 = por %p504_p12, %p503_p10 }
  0x62   : > { %p506_p2 = pnand %p505_p1, %p499_p4 }
  0x64   : > { %509 = shalt.err (!%p506_p2)
}
  0x65   : > { %s510_s8 = scalar_lea.hbm %s774_s21, 128  ;;  %s514_s18 = scalar_lea.hbm %s823_s2, 256 }
  0x66   : > { %p511_p9 = scmp.ne.s32.totalorder %s774_s21, %s510_s8  ;;  %p515_p6 = scmp.lt.u32.totalorder %s774_s21, %s823_s2 }
  0x67   : > { %p516_p13 = scmp.lt.u32.totalorder %s514_s18, %s510_s8  ;;  %p518_p8 = scmp.lt.u32.totalorder %s510_s8, %s774_s21 }
  0x68   : > { %p512_p11 = pnand %p511_p9, %p836_p0 }
  0x69   : > { %p517_p5 = por %p516_p13, %p515_p6 }
  0x6a   : > { %p513_p3 = pneg %p512_p11 }
  0x6b   : > { %p519_p7 = por %p518_p8, %p517_p5 }
  0x6d   : > { %p520_p4 = pnand %p519_p7, %p513_p3 }
  0x6f   : > { %523 = shalt.err (!%p520_p4)
}
  0x70   : > { %372 = dma.vmem_to_hbm [thread:$0]  (%p836_p0), %s769_s20, 128, %s774_s21, %s227_s29  }
  0x71 PF: > { %s253_s5 = sand.u32 1, %s562_s9   ;;  %p837_p10 = scmp.ne.s32.totalorder %s829_s24, 0 }
  0x72   : > { %p838_p12 = scmp.ge.s32.totalorder %s582_s14, 2  ;;  %s254_s19 = scalar_lea.sflag [#allocation4], %s253_s5 }
  0x74   : > { %p382_p1 = pnand %p838_p12, %p837_p10 }
  0x76   : > { %557 = dma.done.wait (!%p382_p1), %s254_s19, 128  }
  0x77   : > { %559 = vsyncadd (!%p382_p1), %s254_s19, 4294967168  ;;  %s21_s14 = sadd.s32 1, %s582_s14   ;;  %s839_s9 = smov %s566_s10 }
  0x78   : > { %p18_p2 = scmp.ge.s32.totalorder %s21_s14, 4   ;;  %s840_s10 = smov %s570_s11 }
  0x79   : > { %s841_s11 = smov %s658_s23  ;;  %s842_s12 = smov %s578_s13 }
  0x7a   : > { %s843_s13 = smov %s845_s17  ;;  %20 = sbr.rel (!%p18_p2) target bundleno = 8 (0x8), region = 86 }
  0x81   :  { %259 = vsyncpa [#allocation3], 1 }
  0x82   :  { %261 = vsyncpa [#allocation3 + $0x1], 1 }
  0x83   :  { %262 = vsyncpa [#allocation6], 1 }
  0x84   :  { %264 = vsyncpa [#allocation6 + $0x1], 1 }
  0x85   :  { %265 = vsyncpa [#allocation4], 1 }
  0x86   :  { %267 = vsyncpa [#allocation4 + $0x1], 1 }

</bundles_post_ra>
